<compile_context>
chip_gen: v7x
topology: tpu7x:2x2x1
jax: 0.10.0
libtpu: 0.0.40
codegen_flags: <defaults>
</compile_context>

<pallas_src>
import numpy as np
import jax
import jax.numpy as jnp
from jax.experimental import pallas as pl
from jax.experimental.pallas import tpu as pltpu


_LANE = 512          # lane width of the packed slab (multiple of 128)
_MAX_BLOCK_R = 128   # sublane rows per grid step (multiple of 8)


def _round_up(x, m):
    return ((x + m - 1) // m) * m


# ---------------------------------------------------------------------------
# Pallas kernels: elementwise affine on (n_ops, block_r, LANE) input blocks.
#   plane 0 = x, plane 1 = theta0 (expanded), plane 2 = theta1 (expanded)
# ---------------------------------------------------------------------------
def _linear_kernel(ops_ref, o_ref):
    o_ref[...] = ops_ref[0] * ops_ref[2] + ops_ref[1]


def _shift_kernel(ops_ref, o_ref):
    o_ref[...] = ops_ref[0] + ops_ref[1]


def _fused_affine(ops):
    """ops: (n_ops, R, LANE) float32 with R % block_r == 0, LANE % 128 == 0."""
    n_ops, R, L = ops.shape
    block_r = min(_MAX_BLOCK_R, R)
    grid = (R // block_r,)
    in_spec = pl.BlockSpec((n_ops, block_r, L), lambda i: (0, i, 0))
    out_spec = pl.BlockSpec((block_r, L), lambda i: (i, 0))
    kernel = _linear_kernel if n_ops == 3 else _shift_kernel
    return pl.pallas_call(
        kernel,
        out_shape=jax.ShapeDtypeStruct((R, L), jnp.float32),
        grid=grid,
        in_specs=[in_spec],
        out_specs=out_spec,
        compiler_params=pltpu.CompilerParams(
            dimension_semantics=("parallel",)),
    )(ops)


# ---------------------------------------------------------------------------
# Module port
# ---------------------------------------------------------------------------
class TimeReparameterization:
    """JAX/Pallas port of Time_reparameterization."""

    def __init__(self, N_subjects, N_biomarkers, reparametrization_type):
        self.N_subjects = N_subjects
        self.N_biomarkers = N_biomarkers
        self.reparametrization_type = reparametrization_type
        if reparametrization_type == "time_shift":
            self.time_parameters = jnp.zeros((N_subjects,), jnp.float32)
        elif reparametrization_type == "linear":
            self.time_parameters0 = jnp.zeros((N_subjects, 1), jnp.float32)
            self.time_parameters1 = jnp.ones((N_subjects, 1), jnp.float32)
        else:
            raise ValueError(
                f"unknown reparametrization_type: {reparametrization_type!r}")
        self.list_id = list(range(N_subjects))

    def set_index(self, list_id):
        return list_id

    def forward(self, x):
        idx = np.asarray(self.set_index(self.list_id), dtype=np.int64)
        B = self.N_biomarkers
        linear = self.reparametrization_type == "linear"

        if linear:
            theta0 = np.asarray(self.time_parameters0, np.float32)[idx, 0]  # (S,)
            theta1 = np.asarray(self.time_parameters1, np.float32)[idx, 0]  # (S,)
        else:
            theta0 = np.asarray(self.time_parameters, np.float32)[idx]      # (S,)
            theta1 = None

        # Host-side ragged packing (plain numpy): one flat measurement stream
        # across all biomarkers, plus the segment-broadcast parameters.
        xs, t0s, t1s, totals = [], [], [], []
        for b in range(B):
            lens = np.asarray([len(x[b][i]) for i in range(len(x[b]))],
                              dtype=np.int64)
            T_b = int(lens.sum())
            totals.append(T_b)
            if T_b == 0:
                continue
            xs.append(np.concatenate(
                [np.asarray(xi, np.float32).ravel() for xi in x[b]]))
            t0s.append(np.repeat(theta0[:len(lens)], lens))
            if linear:
                t1s.append(np.repeat(theta1[:len(lens)], lens))

        T_total = int(sum(totals))
        if T_total == 0:
            return [jnp.zeros((0, 1), jnp.float32) for _ in range(B)]

        n_ops = 3 if linear else 2
        R = _round_up(max(-(-T_total // _LANE), 1), 8)   # rows of LANE lanes
        block_r = min(_MAX_BLOCK_R, R)
        R = _round_up(R, block_r)

        # Dense slab: one device transfer, one kernel launch.
        ops_np = np.zeros((n_ops, R * _LANE), np.float32)
        ops_np[0, :T_total] = np.concatenate(xs)
        ops_np[1, :T_total] = np.concatenate(t0s)
        if linear:
            ops_np[2, :T_total] = np.concatenate(t1s)
        ops_np = ops_np.reshape(n_ops, R, _LANE)

        out_flat = _fused_affine(jnp.asarray(ops_np)).reshape(-1)

        output_x = []
        off = 0
        for b in range(B):
            T_b = totals[b]
            output_x.append(out_flat[off:off + T_b].reshape(T_b, 1))
            off += T_b
        return output_x


# ---------------------------------------------------------------------------
# Self-test
# ---------------------------------------------------------------------------
if __name__ == "__main__":
    N_subjects = 6
    N_biomarkers = 3
    key = jax.random.PRNGKey(0)

    # Ragged per-subject measurement counts (different per biomarker).
    lengths = [
        [2, 3, 1, 4, 2, 3],
        [3, 1, 2, 2, 4, 1],
        [1, 2, 3, 2, 1, 4],
    ]

    # Deterministic ragged inputs.
    x = []
    k = key
    for b in range(N_biomarkers):
        subj_list = []
        for i in range(N_subjects):
            k, sub = jax.random.split(k)
            subj_list.append(
                jax.random.normal(sub, (lengths[b][i],), dtype=jnp.float32))
        x.append(subj_list)

    ok = True

    # --- 'linear' reparametrization ---
    model = TimeReparameterization(N_subjects, N_biomarkers, "linear")
    k, k0, k1 = jax.random.split(k, 3)
    model.time_parameters0 = 0.1 * jax.random.normal(
        k0, (N_subjects, 1), dtype=jnp.float32)
    model.time_parameters1 = 1.0 + 0.1 * jax.random.normal(
        k1, (N_subjects, 1), dtype=jnp.float32)

    outs = [jax.block_until_ready(o) for o in model.forward(x)]

    for b in range(N_biomarkers):
        lens = lengths[b]
        t0 = np.repeat(np.asarray(model.time_parameters0[:, 0]), lens)
        t1 = np.repeat(np.asarray(model.time_parameters1[:, 0]), lens)
        cat_x = np.concatenate([np.asarray(xi) for xi in x[b]])
        ref = (cat_x * t1 + t0).reshape(-1, 1)
        got = np.asarray(outs[b])
        if got.shape != ref.shape or not np.allclose(got, ref, rtol=1e-5, atol=1e-5):
            ok = False

    # --- 'time_shift' reparametrization ---
    model_ts = TimeReparameterization(N_subjects, N_biomarkers, "time_shift")
    k, ks = jax.random.split(k)
    model_ts.time_parameters = 0.1 * jax.random.normal(
        ks, (N_subjects,), dtype=jnp.float32)
    outs_ts = [jax.block_until_ready(o) for o in model_ts.forward(x)]

    for b in range(N_biomarkers):
        lens = lengths[b]
        shift = np.repeat(np.asarray(model_ts.time_parameters), lens)
        cat_x = np.concatenate([np.asarray(xi) for xi in x[b]])
        ref = (cat_x + shift).reshape(-1, 1)
        got = np.asarray(outs_ts[b])
        if got.shape != ref.shape or not np.allclose(got, ref, rtol=1e-5, atol=1e-5):
            ok = False

    if ok:
        print("KERNEL_OK")
    else:
        print("MISMATCH")
</pallas_src>

<mosaic_0001>
module attributes {stable_mosaic.version = 11 : i64} {
  func.func @_linear_kernel(%arg0: i32, %arg1: memref<3x8x512xf32, #tpu.memory_space<vmem>>, %arg2: memref<8x512xf32, #tpu.memory_space<vmem>>) attributes {dimension_semantics = [#tpu.dimension_semantics<parallel>], iteration_bounds = array<i64: 1>, scalar_prefetch = 0 : i64, scratch_operands = 0 : i64, tpu.core_type = #tpu.core_type<tc>, window_params = [{transform_indices = @transform_0, window_bounds = array<i64: 3, 8, 512>}, {transform_indices = @transform_1, window_bounds = array<i64: 8, 512>}]} {
    %c0 = arith.constant 0 : index
    %c0_0 = arith.constant 0 : index
    %c0_1 = arith.constant 0 : index
    %0 = vector.load %arg1[%c0, %c0_0, %c0_1] : memref<3x8x512xf32, #tpu.memory_space<vmem>>, vector<1x8x512xf32>
    %1 = vector.shape_cast %0 : vector<1x8x512xf32> to vector<8x512xf32>
    %c2 = arith.constant 2 : index
    %c0_2 = arith.constant 0 : index
    %c0_3 = arith.constant 0 : index
    %2 = vector.load %arg1[%c2, %c0_2, %c0_3] : memref<3x8x512xf32, #tpu.memory_space<vmem>>, vector<1x8x512xf32>
    %3 = vector.shape_cast %2 : vector<1x8x512xf32> to vector<8x512xf32>
    %4 = arith.mulf %1, %3 : vector<8x512xf32>
    %c1 = arith.constant 1 : index
    %c0_4 = arith.constant 0 : index
    %c0_5 = arith.constant 0 : index
    %5 = vector.load %arg1[%c1, %c0_4, %c0_5] : memref<3x8x512xf32, #tpu.memory_space<vmem>>, vector<1x8x512xf32>
    %6 = vector.shape_cast %5 : vector<1x8x512xf32> to vector<8x512xf32>
    %7 = arith.addf %4, %6 : vector<8x512xf32>
    %c0_6 = arith.constant 0 : index
    %c0_7 = arith.constant 0 : index
    %8 = vector.load %arg2[%c0_6, %c0_7] : memref<8x512xf32, #tpu.memory_space<vmem>>, vector<8x512xf32>
    tpu.vector_store %arg2[%c0_6, %c0_7], %7 {strides = array<i32>} : memref<8x512xf32, #tpu.memory_space<vmem>>, vector<8x512xf32>,
    return
  }
  func.func @transform_0(%arg0: i32) -> (i32, i32, i32) {
    %c0_i32 = arith.constant 0 : i32
    %c0_i32_0 = arith.constant 0 : i32
    %c0_i32_1 = arith.constant 0 : i32
    return %c0_i32, %arg0, %c0_i32_0 : i32, i32, i32
  }
  func.func @transform_1(%arg0: i32) -> (i32, i32) {
    %c0_i32 = arith.constant 0 : i32
    %c0_i32_0 = arith.constant 0 : i32
    return %arg0, %c0_i32 : i32, i32
  }
}

</mosaic_0001>

<bundles_post_ra>
// kernel: tpu_custom_call.1
= control target key start
LH: loop header
LB: loop body
LE: loop exit
PB: predicated region body
PF: predicated region fallthrough
CT: control target
= control target key end

     0   :  { %6 = vsyncpa [#allocation3], 0  ;;  %s154_s0 = inlined_call_operand.hbm [shape: f32[3,8,512], index: 0, kind: input, shape index: {}]   ;;  %s155_s1 = inlined_call_operand.hbm [shape: f32[8,512], index: 1, kind: output, shape index: {}]  }
   0x1   :  { %7 = vsyncpa [#allocation4], 0  ;;  %s116_s6 = smov [#allocation2]   ;;  %s68_s10 = scalar_lea.hbm %s154_s0, 1536 }
   0x2   :  { %s13_s7 = sshll.u32 %s116_s6, 4  ;;  %p69_p0 = scmp.ne.s32.totalorder %s154_s0, %s68_s10  ;;  %s14_s7 = int_to_ptr.vmem [resolvable:$true] %s13_s7 }
   0x3   :  { %p72_p1 = scmp.lt.u32.totalorder %s68_s10, %s154_s0 }
   0x5   :  { %p74_p2 = pnand %p72_p1, %p69_p0 }
   0x7   :  { %77 = shalt.err (!%p74_p2)
}
   0x8   :  { %s78_s15 = scalar_lea.vmem %s14_s7, 1536  ;;  %p83_p4 = scmp.lt.s32.totalorder %s14_s7, %s14_s7 }
   0x9   :  { %p79_p3 = scmp.ne.s32.totalorder %s14_s7, %s78_s15  ;;  %p84_p5 = scmp.lt.s32.totalorder %s78_s15, %s78_s15 }
   0xb   :  { %p85_p6 = por %p84_p5, %p83_p4 }
   0xd   :  { %p86_p7 = pnand %p85_p6, %p79_p3 }
   0xf   :  { %89 = shalt.err (!%p86_p7)
}
  0x10   :  { %s117_s16 = smov 512   ;;  %s118_s17 = smov 32  }
  0x11   :  { %19 = dma.hbm_to_vmem [thread:$0]  %s154_s0, 1536, %s14_s7, [#allocation3], %s117_s16, %s117_s16, %s118_s17  }
  0x12   :  { %112 = dma.done.wait [#allocation3], 1536  }
  0x13   :  { %113 = vsyncadd [#allocation3], 4294965760  ;;  %v23_v0 = vld [vmem:[#allocation2] sm:$0xff]  ;;  %v24_v4 = vld [vmem:[#allocation2 + $0x8] sm:$0xff]  ;;  %s119_s20 = smov [#allocation5]  }
  0x14   :  { %v28_v1 = vld [vmem:[#allocation2 + $0x40] sm:$0xff]  ;;  %v29_v5 = vld [vmem:[#allocation2 + $0x48] sm:$0xff]  ;;  %v25_v8 = vld [vmem:[#allocation2 + $0x10] sm:$0xff]  ;;  %s55_s0 = sshll.u32 %s119_s20, 4  ;;  %s56_s0 = int_to_ptr.vmem [resolvable:$true] %s55_s0 }
  0x15   :  { %v37_v2 = vld [vmem:[#allocation2 + $0x20] sm:$0xff]  ;;  %v32_v3 = vmul.f32 %v28_v1, %v23_v0  ;;  %v38_v6 = vld [vmem:[#allocation2 + $0x28] sm:$0xff]  ;;  %v33_v7 = vmul.f32 %v29_v5, %v24_v4  ;;  %v30_v9 = vld [vmem:[#allocation2 + $0x50] sm:$0xff]  ;;  %s90_s21 = scalar_lea.vmem %s56_s0, 512  ;;  %p95_p9 = scmp.lt.s32.totalorder %s56_s0, %s56_s0 }
  0x16   :  { %v39_v10 = vld [vmem:[#allocation2 + $0x30] sm:$0xff]  ;;  %v34_v12 = vmul.f32 %v30_v9, %v25_v8  ;;  %v26_v13 = vld [vmem:[#allocation2 + $0x18] sm:$0xff]  ;;  %p91_p8 = scmp.ne.s32.totalorder %s56_s0, %s90_s21  ;;  %p96_p10 = scmp.lt.s32.totalorder %s90_s21, %s90_s21 }
  0x17   :  { %v41_v11 = vadd.f32 %v37_v2, %v32_v3  ;;  %v31_v14 = vld [vmem:[#allocation2 + $0x58] sm:$0xff]  ;;  %v42_v16 = vadd.f32 %v38_v6, %v33_v7 }
  0x18   :  { %v40_v15 = vld [vmem:[#allocation2 + $0x38] sm:$0xff]  ;;  %v35_v17 = vmul.f32 %v31_v14, %v26_v13  ;;  %v43_v18 = vadd.f32 %v39_v10, %v34_v12  ;;  %p97_p11 = por %p96_p10, %p95_p9 }
  0x19   :  { %45 = vst [vmem:[#allocation5] sm:$0xff] %v41_v11  ;;  %46 = vst [vmem:[#allocation5 + $0x8] sm:$0xff] %v42_v16 }
  0x1a   :  { %v44_v19 = vadd.f32 %v40_v15, %v35_v17  ;;  %47 = vst [vmem:[#allocation5 + $0x10] sm:$0xff] %v43_v18  ;;  %p98_p12 = pnand %p97_p11, %p91_p8 }
  0x1c   :  { %48 = vst [vmem:[#allocation5 + $0x18] sm:$0xff] %v44_v19 }
  0x1d   :  { %101 = shalt.err (!%p98_p12)
}
  0x1e   :  { %s102_s24 = scalar_lea.hbm %s155_s1, 512 }
  0x1f   :  { %p103_p13 = scmp.ne.s32.totalorder %s155_s1, %s102_s24  ;;  %p106_p0 = scmp.lt.u32.totalorder %s102_s24, %s155_s1 }
  0x21   :  { %p108_p1 = pnand %p106_p0, %p103_p13 }
  0x23   :  { %111 = shalt.err (!%p108_p1)
}
  0x24   :  { %58 = dma.vmem_to_hbm [thread:$0]  %s56_s0, 512, %s155_s1, [#allocation4]  }
  0x25   :  { %114 = dma.done.wait [#allocation4], 512  }
  0x26   :  { %115 = vsyncadd [#allocation4], 4294966784 }
  0x27   :  { %62 = vsyncpa [#allocation3], 1 }
  0x28   :  { %63 = vsyncpa [#allocation4], 1 }

</bundles_post_ra>
